<compile_context>
chip_gen: v6e
topology: v6e:2x2x1
jax: 0.10.0
libtpu: 0.0.40
codegen_flags: <defaults>
</compile_context>

<pallas_src>
import functools

import jax
import jax.numpy as jnp
from jax.experimental import pallas as pl
from jax.experimental.pallas import tpu as pltpu

NEG_SLOPE = 0.01


def _round_up(x, m):
    return -(-x // m) * m


def policy_value_kernel(x_ref, w0_ref, w1_ref, wh_ref, b_ref, out_ref,
                        *, hidden_dim, policy_dim):
    H, P = hidden_dim, policy_dim
    head_pad = wh_ref.shape[1]

    # Row-packed biases (each starts at lane 0 -> aligned, free slices).
    b0 = b_ref[0:1, :H]
    b1 = b_ref[1:2, :H]
    bh = b_ref[2:3, :head_pad]

    # In-kernel cast to bf16 for the MXU; accumulate in f32.
    x = x_ref[...].astype(w0_ref.dtype)

    h = jnp.dot(x, w0_ref[...], preferred_element_type=jnp.float32) + b0
    h = jnp.maximum(h, NEG_SLOPE * h)                      # leaky_relu

    h = jnp.dot(h.astype(w1_ref.dtype), w1_ref[...],
                preferred_element_type=jnp.float32) + b1
    h = jnp.maximum(h, NEG_SLOPE * h)

    # Fused policy+value head: one lane-dense [TB, head_pad] matmul.
    logits = jnp.dot(h.astype(wh_ref.dtype), wh_ref[...],
                     preferred_element_type=jnp.float32) + bh

    # Value: tanh of the single value column only (narrow, cheap).
    value = jnp.tanh(logits[:, P:P + 1])

    # Numerically stable softmax over policy lanes [0, P); padded lanes -> 0.
    lane = jax.lax.broadcasted_iota(jnp.int32, logits.shape, 1)
    masked = jnp.where(lane < P, logits, -jnp.inf)
    m = jnp.max(masked, axis=-1, keepdims=True)
    exps = jnp.exp(masked - m)
    denom = jnp.sum(exps, axis=-1, keepdims=True)
    policy = exps / denom                                  # exact normalization

    out_ref[...] = policy.astype(out_ref.dtype)
    out_ref[:, P:P + 1] = value.astype(out_ref.dtype)      # narrow second store


def pack_params(params, compute_dtype=jnp.bfloat16):
    """One-time packing of weights/biases (hoisted out of the per-call path).

    Weights are stored transposed vs PyTorch ([in, out]). Policy/value head
    weights are fused into a zero-padded lane-dense [H, head_pad] matrix;
    biases are packed row-wise into a [3, W] array (b0 / b1 / fused head)."""
    state_dim, hidden_dim = params["w0"].shape
    policy_dim = params["wp"].shape[1]
    head_pad = max(128, _round_up(policy_dim + 1, 128))
    bias_w = max(head_pad, _round_up(hidden_dim, 128))

    wh = jnp.zeros((hidden_dim, head_pad), jnp.float32)
    wh = wh.at[:, :policy_dim].set(params["wp"])
    wh = wh.at[:, policy_dim:policy_dim + 1].set(params["wv"])

    biases = jnp.zeros((3, bias_w), jnp.float32)
    biases = biases.at[0, :hidden_dim].set(params["b0"][0])
    biases = biases.at[1, :hidden_dim].set(params["b1"][0])
    biases = biases.at[2, :policy_dim].set(params["bp"][0])
    biases = biases.at[2, policy_dim].set(params["bv"][0, 0])

    return (params["w0"].astype(compute_dtype),
            params["w1"].astype(compute_dtype),
            wh.astype(compute_dtype),
            biases)


@functools.partial(jax.jit, static_argnames=("policy_dim", "batch_tile"))
def policy_value_net(x, w0, w1, wh, biases, *, policy_dim, batch_tile=2048):
    """x: [batch, state_dim] float32. (w0, w1, wh, biases) = pack_params(params)."""
    batch, state_dim = x.shape
    hidden_dim = w0.shape[1]
    head_pad = wh.shape[1]

    # ---- batch-tile selection (VMEM budget, 16-row alignment for bf16) ----
    padded16 = _round_up(batch, 16)
    weight_bytes = (w0.size + w1.size + wh.size) * 2 + biases.size * 4
    per_row_bytes = 2 * 4 * (state_dim + head_pad)   # double-buffered f32 in/out
    vmem_budget = 32 * 1024 * 1024                   # safe on v5e/v6e/v7x
    tb_vmem = max(16, ((vmem_budget - weight_bytes) // max(per_row_bytes, 1))
                  // 16 * 16)
    tb = min(batch_tile, padded16, tb_vmem)
    # v7x: keep >= 2 grid steps so ("parallel",) shards batch across both TCs.
    if padded16 >= 32:
        tb = min(tb, _round_up(pl.cdiv(padded16, 2), 16))
    tb = max(16, tb)
    padded = _round_up(batch, tb)

    x_p = x if padded == batch else jnp.pad(x, ((0, padded - batch), (0, 0)))

    flops = 2 * padded * hidden_dim * (state_dim + hidden_dim + head_pad)
    bytes_accessed = x_p.size * 4 + weight_bytes + padded * head_pad * 4
    transcendentals = padded * (head_pad + 1)

    kernel = functools.partial(policy_value_kernel,
                               hidden_dim=hidden_dim, policy_dim=policy_dim)

    out = pl.pallas_call(
        kernel,
        out_shape=jax.ShapeDtypeStruct((padded, head_pad), jnp.float32),
        grid=(padded // tb,),
        in_specs=[
            pl.BlockSpec((tb, state_dim), lambda i: (i, 0)),            # x tile
            pl.BlockSpec((state_dim, hidden_dim), lambda i: (0, 0)),    # w0 (resident)
            pl.BlockSpec((hidden_dim, hidden_dim), lambda i: (0, 0)),   # w1 (resident)
            pl.BlockSpec((hidden_dim, head_pad), lambda i: (0, 0)),     # fused head w
            pl.BlockSpec(biases.shape, lambda i: (0, 0)),               # row-packed biases
        ],
        out_specs=pl.BlockSpec((tb, head_pad), lambda i: (i, 0)),
        compiler_params=pltpu.CompilerParams(
            dimension_semantics=("parallel",),
            vmem_limit_bytes=48 * 1024 * 1024),
        cost_estimate=pl.CostEstimate(flops=flops,
                                      transcendentals=transcendentals,
                                      bytes_accessed=bytes_accessed),
    )(x_p, w0, w1, wh, biases)

    policy = out[:batch, :policy_dim]
    value = out[:batch, policy_dim:policy_dim + 1]
    return policy, value


def init_params(key, state_dim, policy_dim, hidden_dim):
    """Deterministic init matching PyTorch nn.Linear shapes (stored transposed)."""
    def linear(k, fan_in, fan_out):
        kw, kb = jax.random.split(k)
        bound = 1.0 / jnp.sqrt(fan_in)
        w = jax.random.uniform(kw, (fan_in, fan_out), jnp.float32, -bound, bound)
        b = jax.random.uniform(kb, (1, fan_out), jnp.float32, -bound, bound)
        return w, b

    k0, k1, k2, k3 = jax.random.split(key, 4)
    w0, b0 = linear(k0, state_dim, hidden_dim)
    w1, b1 = linear(k1, hidden_dim, hidden_dim)
    wp, bp = linear(k2, hidden_dim, policy_dim)
    wv, bv = linear(k3, hidden_dim, 1)
    return dict(w0=w0, b0=b0, w1=w1, b1=b1, wp=wp, bp=bp, wv=wv, bv=bv)


if __name__ == "__main__":
    batch, state_dim, policy_dim, hidden_dim = 8, 16, 8, 32

    key = jax.random.PRNGKey(0)
    kx, kp = jax.random.split(key)
    x = jax.random.normal(kx, (batch, state_dim), jnp.float32)
    params = init_params(kp, state_dim, policy_dim, hidden_dim)

    packed = pack_params(params)              # one-time packing (outside hot path)
    policy, value = policy_value_net(x, *packed, policy_dim=policy_dim)
    jax.block_until_ready((policy, value))

    # Pure-JAX f32 reference (original module semantics).
    def ref(x, p):
        h = x @ p["w0"] + p["b0"]
        h = jnp.where(h > 0, h, 0.01 * h)
        h = h @ p["w1"] + p["b1"]
        h = jnp.where(h > 0, h, 0.01 * h)
        pol = jax.nn.softmax(h @ p["wp"] + p["bp"], axis=-1)
        val = jnp.tanh(h @ p["wv"] + p["bv"])
        return pol, val

    rp, rv = ref(x, params)
    assert policy.shape == (batch, policy_dim) and value.shape == (batch, 1)
    # Tolerances vs the f32 reference account for bf16 MXU operands.
    assert jnp.allclose(policy, rp, atol=3e-2, rtol=3e-2)
    assert jnp.allclose(value, rv, atol=3e-2, rtol=3e-2)
    # Exact softmax normalization inside the kernel -> rows sum to 1.
    assert jnp.allclose(jnp.sum(policy, axis=-1), 1.0, atol=1e-3)

    print("KERNEL_OK")
</pallas_src>

<mosaic_0001>
module attributes {stable_mosaic.version = 11 : i64} {
  func.func @policy_value_kernel(%arg0: i32, %arg1: memref<16x16xf32, #tpu.memory_space<vmem>>, %arg2: memref<16x32xbf16, #tpu.memory_space<vmem>>, %arg3: memref<32x32xbf16, #tpu.memory_space<vmem>>, %arg4: memref<32x128xbf16, #tpu.memory_space<vmem>>, %arg5: memref<3x128xf32, #tpu.memory_space<vmem>>, %arg6: memref<16x128xf32, #tpu.memory_space<vmem>>) attributes {dimension_semantics = [#tpu.dimension_semantics<parallel>], iteration_bounds = array<i64: 1>, scalar_prefetch = 0 : i64, scratch_operands = 0 : i64, tpu.core_type = #tpu.core_type<tc>, window_params = [{transform_indices = @transform_0, window_bounds = array<i64: 16, 16>}, {pipeline_mode = #tpu.pipeline_mode<synchronous>, transform_indices = @transform_1, window_bounds = array<i64: 16, 32>}, {pipeline_mode = #tpu.pipeline_mode<synchronous>, transform_indices = @transform_2, window_bounds = array<i64: 32, 32>}, {pipeline_mode = #tpu.pipeline_mode<synchronous>, transform_indices = @transform_3, window_bounds = array<i64: 32, 128>}, {pipeline_mode = #tpu.pipeline_mode<synchronous>, transform_indices = @transform_4, window_bounds = array<i64: 3, 128>}, {transform_indices = @transform_5, window_bounds = array<i64: 16, 128>}]} {
    %c0 = arith.constant 0 : index
    %c0_0 = arith.constant 0 : index
    %0 = vector.load %arg5[%c0, %c0_0] : memref<3x128xf32, #tpu.memory_space<vmem>>, vector<1x32xf32>
    %c1 = arith.constant 1 : index
    %c0_1 = arith.constant 0 : index
    %1 = vector.load %arg5[%c1, %c0_1] : memref<3x128xf32, #tpu.memory_space<vmem>>, vector<1x32xf32>
    %c2 = arith.constant 2 : index
    %c0_2 = arith.constant 0 : index
    %2 = vector.load %arg5[%c2, %c0_2] : memref<3x128xf32, #tpu.memory_space<vmem>>, vector<1x128xf32>
    %c0_3 = arith.constant 0 : index
    %c0_4 = arith.constant 0 : index
    %3 = vector.load %arg1[%c0_3, %c0_4] : memref<16x16xf32, #tpu.memory_space<vmem>>, vector<16x16xf32>
    %4 = arith.truncf %3 : vector<16x16xf32> to vector<16x16xbf16>
    %c0_5 = arith.constant 0 : index
    %c0_6 = arith.constant 0 : index
    %5 = vector.load %arg2[%c0_5, %c0_6] : memref<16x32xbf16, #tpu.memory_space<vmem>>, vector<16x32xbf16>
    %cst = arith.constant dense<0.000000e+00> : vector<16x32xf32>
    %6 = tpu.matmul %4, %5, %cst {dimension_numbers = #tpu.dot_dimension_numbers<[1], [0], [0], [1], [0, 0, 1, 1], [], []>} : vector<16x16xbf16>, vector<16x32xbf16>, vector<16x32xf32> -> vector<16x32xf32>
    %7 = vector.broadcast %0 : vector<1x32xf32> to vector<16x32xf32>
    %8 = arith.addf %6, %7 : vector<16x32xf32>
    %cst_7 = arith.constant 0.00999999977 : f32
    %9 = vector.broadcast %cst_7 : f32 to vector<16x32xf32>
    %10 = arith.mulf %9, %8 : vector<16x32xf32>
    %11 = arith.maximumf %8, %10 : vector<16x32xf32>
    %12 = arith.truncf %11 : vector<16x32xf32> to vector<16x32xbf16>
    %c0_8 = arith.constant 0 : index
    %c0_9 = arith.constant 0 : index
    %13 = vector.load %arg3[%c0_8, %c0_9] : memref<32x32xbf16, #tpu.memory_space<vmem>>, vector<32x32xbf16>
    %cst_10 = arith.constant dense<0.000000e+00> : vector<16x32xf32>
    %14 = tpu.matmul %12, %13, %cst_10 {dimension_numbers = #tpu.dot_dimension_numbers<[1], [0], [0], [1], [0, 0, 1, 1], [], []>} : vector<16x32xbf16>, vector<32x32xbf16>, vector<16x32xf32> -> vector<16x32xf32>
    %15 = vector.broadcast %1 : vector<1x32xf32> to vector<16x32xf32>
    %16 = arith.addf %14, %15 : vector<16x32xf32>
    %cst_11 = arith.constant 0.00999999977 : f32
    %17 = vector.broadcast %cst_11 : f32 to vector<16x32xf32>
    %18 = arith.mulf %17, %16 : vector<16x32xf32>
    %19 = arith.maximumf %16, %18 : vector<16x32xf32>
    %20 = arith.truncf %19 : vector<16x32xf32> to vector<16x32xbf16>
    %c0_12 = arith.constant 0 : index
    %c0_13 = arith.constant 0 : index
    %21 = vector.load %arg4[%c0_12, %c0_13] : memref<32x128xbf16, #tpu.memory_space<vmem>>, vector<32x128xbf16>
    %cst_14 = arith.constant dense<0.000000e+00> : vector<16x128xf32>
    %22 = tpu.matmul %20, %21, %cst_14 {dimension_numbers = #tpu.dot_dimension_numbers<[1], [0], [0], [1], [0, 0, 1, 1], [], []>} : vector<16x32xbf16>, vector<32x128xbf16>, vector<16x128xf32> -> vector<16x128xf32>
    %23 = vector.broadcast %2 : vector<1x128xf32> to vector<16x128xf32>
    %24 = arith.addf %22, %23 : vector<16x128xf32>
    %25 = vector.extract_strided_slice %24 {offsets = [0, 8], sizes = [16, 1], strides = [1, 1]} : vector<16x128xf32> to vector<16x1xf32>
    %26 = math.tanh %25 : vector<16x1xf32>
    %27 = tpu.iota {dimensions = array<i32: 1>} : vector<16x128xi32>
    %c8_i32 = arith.constant 8 : i32
    %28 = vector.broadcast %c8_i32 : i32 to vector<16x128xi32>
    %29 = arith.cmpi slt, %27, %28 : vector<16x128xi32>
    %cst_15 = arith.constant 0xFF800000 : f32
    %30 = vector.broadcast %cst_15 : f32 to vector<16x128xf32>
    %31 = arith.select %29, %24, %30 : vector<16x128xi1>, vector<16x128xf32>
    %cst_16 = arith.constant dense<0xFF800000> : vector<16xf32>
    %32 = vector.multi_reduction <maximumf>, %31, %cst_16 [1] : vector<16x128xf32> to vector<16xf32>
    %33 = vector.shape_cast %32 : vector<16xf32> to vector<16x1xf32>
    %34 = vector.broadcast %33 : vector<16x1xf32> to vector<16x128xf32>
    %35 = arith.subf %31, %34 : vector<16x128xf32>
    %36 = math.exp %35 : vector<16x128xf32>
    %cst_17 = arith.constant dense<0.000000e+00> : vector<16xf32>
    %37 = vector.multi_reduction <add>, %36, %cst_17 [1] : vector<16x128xf32> to vector<16xf32>
    %38 = vector.shape_cast %37 : vector<16xf32> to vector<16x1xf32>
    %39 = vector.broadcast %38 : vector<16x1xf32> to vector<16x128xf32>
    %40 = arith.divf %36, %39 : vector<16x128xf32>
    %c0_18 = arith.constant 0 : index
    %c0_19 = arith.constant 0 : index
    %41 = vector.load %arg6[%c0_18, %c0_19] : memref<16x128xf32, #tpu.memory_space<vmem>>, vector<16x128xf32>
    tpu.vector_store %arg6[%c0_18, %c0_19], %40 {strides = array<i32>} : memref<16x128xf32, #tpu.memory_space<vmem>>, vector<16x128xf32>,
    %c0_20 = arith.constant 0 : index
    %c8 = arith.constant 8 : index
    %42 = vector.load %arg6[%c0_20, %c8] : memref<16x128xf32, #tpu.memory_space<vmem>>, vector<16x1xf32>
    tpu.vector_store %arg6[%c0_20, %c8], %26 {strides = array<i32>} : memref<16x128xf32, #tpu.memory_space<vmem>>, vector<16x1xf32>,
    return
  }
  func.func @transform_0(%arg0: i32) -> (i32, i32) {
    %c0_i32 = arith.constant 0 : i32
    %c0_i32_0 = arith.constant 0 : i32
    return %arg0, %c0_i32 : i32, i32
  }
  func.func @transform_1(%arg0: i32) -> (i32, i32) {
    %c0_i32 = arith.constant 0 : i32
    %c0_i32_0 = arith.constant 0 : i32
    %c0_i32_1 = arith.constant 0 : i32
    return %c0_i32, %c0_i32_0 : i32, i32
  }
  func.func @transform_2(%arg0: i32) -> (i32, i32) {
    %c0_i32 = arith.constant 0 : i32
    %c0_i32_0 = arith.constant 0 : i32
    %c0_i32_1 = arith.constant 0 : i32
    return %c0_i32, %c0_i32_0 : i32, i32
  }
  func.func @transform_3(%arg0: i32) -> (i32, i32) {
    %c0_i32 = arith.constant 0 : i32
    %c0_i32_0 = arith.constant 0 : i32
    %c0_i32_1 = arith.constant 0 : i32
    return %c0_i32, %c0_i32_0 : i32, i32
  }
  func.func @transform_4(%arg0: i32) -> (i32, i32) {
    %c0_i32 = arith.constant 0 : i32
    %c0_i32_0 = arith.constant 0 : i32
    %c0_i32_1 = arith.constant 0 : i32
    return %c0_i32, %c0_i32_0 : i32, i32
  }
  func.func @transform_5(%arg0: i32) -> (i32, i32) {
    %c0_i32 = arith.constant 0 : i32
    %c0_i32_0 = arith.constant 0 : i32
    return %arg0, %c0_i32 : i32, i32
  }
}

</mosaic_0001>

<bundles_post_ra>
// kernel: policy_value_net.1
= control target key start
LH: loop header
LB: loop body
LE: loop exit
PB: predicated region body
PF: predicated region fallthrough
CT: control target
= control target key end

     0   :  { %10 = vsyncpa [#allocation3], 0  ;;  %s357_s18 = smov [#allocation2]   ;;  %s433_s0 = inlined_call_operand.vmem [shape: f32[16,16], index: 0, kind: input, shape index: {}]   ;;  %s434_s1 = inlined_call_operand.vmem [shape: bf16[16,32], index: 1, kind: input, shape index: {}]   ;;  %s435_s2 = inlined_call_operand.vmem [shape: bf16[32,32], index: 2, kind: input, shape index: {}]   ;;  %s436_s3 = inlined_call_operand.hbm [shape: bf16[32,128], index: 3, kind: input, shape index: {}]   ;;  %s437_s4 = inlined_call_operand.vmem [shape: f32[3,128], index: 4, kind: input, shape index: {}]   ;;  %s438_s5 = inlined_call_operand.vmem [shape: f32[16,128], index: 5, kind: output, shape index: {}]  }
   0x1   :  { %s22_s19 = sshll.u32 %s357_s18, 4  ;;  %s23_s19 = int_to_ptr.vmem [resolvable:$true] %s22_s19 }
   0x2   :  { %s343_s20 = scalar_lea.vmem %s23_s19, 256  ;;  %p348_p1 = scmp.lt.s32.totalorder %s23_s19, %s23_s19 }
   0x3   :  { %p344_p0 = scmp.ne.s32.totalorder %s23_s19, %s343_s20  ;;  %p349_p2 = scmp.lt.s32.totalorder %s343_s20, %s343_s20 }
   0x5   :  { %p350_p3 = por %p349_p2, %p348_p1 }
   0x7   :  { %p351_p4 = pnand %p350_p3, %p344_p0 }
   0x9   :  { %354 = shalt.err (!%p351_p4)
}
   0xa   :  { %s358_s21 = smov 64   ;;  %s359_s22 = smov 4  }
   0xb   :  { %28 = dma.hbm_to_vmem [thread:$0]  %s436_s3, 256, %s23_s19, [#allocation3], %s358_s21, %s358_s21, %s359_s22  }
   0xc   :  { %355 = dma.done.wait [#allocation3], 256  }
   0xd   :  { %356 = vsyncadd [#allocation3], 4294967040  ;;  %v360_v0 = vmov 0.0   ;;  %vm361_vm0 = vmmov 0   ;;  %v318_v1 = vld [vmem:[%s434_s1] sm:$0xff]   ;;  %v39_v3 = vld [vmem:[%s433_s0 + $0x8] sm:$0xff]  ;;  %v239_v33 = vlaneseq }
   0xe   :  { %291 = vmatprep.subr.bf16.mxu0 %v360_v0  ;;  %293 = vmatprep.mubr.msk.bf16.mxu0 %vm361_vm0, %v360_v0  ;;  %v38_v2 = vld [vmem:[%s433_s0] sm:$0xff]  ;;  %vm53_vm1 = vcmask 130048   ;;  %v319_v5 = vld [vmem:[%s435_s2 + $0x8] sm:$0xff]   ;;  %vm123_vm2 = vcmask 261120   ;;  %vm264_vm4 = vcmask 72768  }
   0xf   :  { %297 = vmatprep.subr.bf16.mxu1 %v360_v0  ;;  %301 = vmatprep.mubr.msk.bf16.mxu1 %vm361_vm0, %v360_v0  ;;  %v40_v4 = vpack.c.bf16 %v39_v3, %v38_v2  ;;  %v320_v6 = vld [vmem:[%s435_s2] sm:$0xff]   ;;  %v321_v19 = vld [vmem:[#allocation2 + $0x8] sm:$0xff]   ;;  %v240_v34 = vand.u32 127, %v239_v33 }
  0x10   :  { %292 = vmatpush3.bf16.msra.mxu0 %v318_v1  ;;  %298 = vmatpush3.bf16.msra.mxu1 %v319_v5  ;;  %v272_v7 = vld [vmem:[%s437_s4] ss:$0 sm:$0xff]  ;;  %v275_v21 = vld [vmem:[%s437_s4 + $0x1] ss:$0 sm:$0xff]  ;;  %v279_v35 = vld [vmem:[%s437_s4 + $0x2] ss:$0 sm:$0xff] }
  0x11   :  { %305 = vmatprep.subr.bf16.mxu0 %v360_v0  ;;  %299 = vmatprep.subr.bf16.mxu1 %v360_v0  ;;  %v322_v20 = vld [vmem:[#allocation2] sm:$0xff]   ;;  %vm241_vm3 = vcmp.lt.s32.totalorder %v240_v34, 8 }
  0x13   :  { %294 = vmatmul.mubr.msk.bf16.vlgmr.msra.gmra.mxu0 %vm53_vm1, %v40_v4 }
  0x14   :  { %309 = vmatprep.mubr.msk.bf16.mxu0 %vm361_vm0, %v360_v0  ;;  %300 = vmatpush3.bf16.msra.mxu1 %v320_v6 }
  0x15   :  { %306 = vmatpush3.bf16.msra.mxu0 %v321_v19 }
  0x16   :  { %307 = vmatprep.subr.bf16.mxu0 %v360_v0 }
  0x19   :  { %308 = vmatpush3.bf16.msra.mxu0 %v322_v20 }
  0xd3   :  { %v91_v8 = vpop.f32.mrf.mxu0 }
  0xd4   :  { %v92_v9 = vadd.f32 %v272_v7, %v91_v8 }
  0xd5   :  { %v295_v10 = vpop.f32.mrf.mxu0 }
  0xd6   :  { %v98_v12 = vmul.f32 0.01, %v92_v9 }
  0xd7   :  { %v94_v11 = vpop.f32.mrf.mxu0 }
  0xd8   :  { %v95_v13 = vadd.f32 %v272_v7, %v94_v11  ;;  %v100_v16 = vmax.f32 %v92_v9, %v98_v12 }
  0xd9   :  { %v296_v14 = vpop.f32.mrf.mxu0 }
  0xda   :  { %v99_v15 = vmul.f32 0.01, %v95_v13 }
  0xdc   :  { %v101_v17 = vmax.f32 %v95_v13, %v99_v15 }
  0xde   :  { %v102_v18 = vpack.c.bf16 %v101_v17, %v100_v16 }
  0xe0   :  { %302 = vmatmul.mubr.msk.bf16.vlgmr.msra.gmra.mxu1 %vm123_vm2, %v102_v18 }
 0x1a0   :  { %v161_v22 = vpop.f32.mrf.mxu1 }
 0x1a1   :  { %v162_v23 = vadd.f32 %v275_v21, %v161_v22 }
 0x1a2   :  { %v303_v24 = vpop.f32.mrf.mxu1 }
 0x1a3   :  { %v168_v26 = vmul.f32 0.01, %v162_v23 }
 0x1a4   :  { %v164_v25 = vpop.f32.mrf.mxu1 }
 0x1a5   :  { %v165_v27 = vadd.f32 %v275_v21, %v164_v25  ;;  %v170_v30 = vmax.f32 %v162_v23, %v168_v26 }
 0x1a6   :  { %v304_v28 = vpop.f32.mrf.mxu1 }
 0x1a7   :  { %v169_v29 = vmul.f32 0.01, %v165_v27 }
 0x1a9   :  { %v171_v31 = vmax.f32 %v165_v27, %v169_v29 }
 0x1ab   :  { %v172_v32 = vpack.c.bf16 %v171_v31, %v170_v30 }
 0x1ad   :  { %310 = vmatmul.mubr.msk.bf16.vlgmr.msra.gmra.mxu0 %vm123_vm2, %v172_v32 }
 0x26d   :  { %v230_v36 = vpop.f32.mrf.mxu0 }
 0x26e   :  { %v231_v37 = vadd.f32 %v279_v35, %v230_v36 }
 0x26f   :  { %v311_v38 = vpop.f32.mrf.mxu0 }
 0x270   :  { %v242_v39 = vsel %vm241_vm3, %v231_v37, -inf }
 0x271   :  { %244 = vmax.xlane.f32.xlu0 %v242_v39  ;;  %v233_v40 = vpop.f32.mrf.mxu0 }
 0x272   :  { %v234_v41 = vadd.f32 %v279_v35, %v233_v40 }
 0x273   :  { %v312_v42 = vpop.f32.mrf.mxu0 }
 0x274   :  { %v243_v43 = vsel %vm241_vm3, %v234_v41, -inf }
 0x275   :  { %246 = vmax.xlane.f32.xlu0 %v243_v43 }
 0x2fa   :  { %v245_v44 = vpop.xlane.xlu0 %244 }
 0x2fb   :  { %v248_v45 = vsub.f32 %v242_v39, %v245_v44 }
 0x2fd   :  { %v250_v46 = vmul.f32 1.442695, %v248_v45 }
 0x2fe   :  { %v247_v47 = vpop.xlane.xlu0 %246 }
 0x2ff   :  { %323 = vpow2.f32 %v250_v46  ;;  %v249_v48 = vsub.f32 %v243_v43, %v247_v47 }
 0x301   :  { %v252_v49 = vmul.f32 1.442695, %v249_v48 }
 0x303   :  { %325 = vpow2.f32 %v252_v49 }
 0x30c   :  { %v324_v50 = vpop.eup %323 }
 0x30d   :  { %254 = vadd.xlane.f32.xlu1 %v324_v50 }
 0x310   :  { %v326_v51 = vpop.eup %325 }
 0x311   :  { %256 = vadd.xlane.f32.xlu1 %v326_v51 }
 0x396   :  { %v255_v52 = vpop.xlane.xlu1 %254 }
 0x397   :  { %327 = vrcp.f32 %v255_v52 }
 0x398   :  { %329 = vtanh.f32 %v231_v37 }
 0x39a   :  { %v257_v53 = vpop.xlane.xlu1 %256 }
 0x39b   :  { %331 = vrcp.f32 %v257_v53 }
 0x39c   :  { %333 = vtanh.f32 %v234_v41 }
 0x3a4   :  { %v328_v54 = vpop.eup %327 }
 0x3a5   :  { %v259_v55 = vmul.f32 %v328_v54, %v324_v50  ;;  %v330_v56 = vpop.eup %329 }
 0x3a7   :  { %262 = vst [vmem:[%s438_s5] sm:$0xff] %v259_v55 }
 0x3a8   :  { %v332_v57 = vpop.eup %331  ;;  %265 = vst.msk [vmem:[%s438_s5] sm:$0xff] %vm264_vm4, %v330_v56 }
 0x3a9   :  { %v261_v58 = vmul.f32 %v332_v57, %v326_v51  ;;  %v334_v59 = vpop.eup %333 }
 0x3ab   :  { %263 = vst [vmem:[%s438_s5 + $0x8] sm:$0xff] %v261_v58 }
 0x3ac   :  { %266 = vst.msk [vmem:[%s438_s5 + $0x8] sm:$0xff] %vm264_vm4, %v334_v59 }
 0x3ad   :  { %271 = vsyncpa [#allocation3], 1 }

</bundles_post_ra>
